<compile_context>
chip_gen: v5e
topology: v5e:2x2
jax: 0.10.0
libtpu: 0.0.40
codegen_flags: <defaults>
</compile_context>

<pallas_src>
import functools

import jax
import jax.numpy as jnp
from jax import lax
from jax.experimental import pallas as pl
from jax.experimental.pallas import tpu as pltpu

_LANES = 128


def _rmse_partial_kernel(o_ref, t_ref, out_ref, *, block_rows, valid_rows, steps):
    """Per (core, step): add this tile's sum of squared diffs, sublane-reduced
    to a (1, 128) lane vector, into this core's resident output row."""
    c = pl.program_id(0)
    i = pl.program_id(1)

    @pl.when(i == 0)
    def _():
        out_ref[...] = jnp.zeros_like(out_ref)

    # Intended (unclamped) block index for this (core, step).  The input
    # index_map clamps it for the DMA; here we keep the unclamped value so the
    # row mask zeroes out (a) ragged rows past the end of the data and
    # (b) entire duplicate blocks on cores that ran out of real work.
    # Note: int32 math; overflows only past ~2^31 rows (~2.7e11 elements).
    blk = c * steps + i
    row0 = blk * block_rows
    # Only blocks that can contain rows >= valid_rows need masking.
    needs_mask = row0 + block_rows > valid_rows

    @pl.when(jnp.logical_not(needs_mask))
    def _():
        # Steady state (hot path): no iota / compare / select.
        d = o_ref[...].astype(jnp.float32) - t_ref[...].astype(jnp.float32)
        out_ref[...] += jnp.sum(d * d, axis=0, keepdims=True)

    @pl.when(needs_mask)
    def _():
        d = o_ref[...].astype(jnp.float32) - t_ref[...].astype(jnp.float32)
        row_ids = row0 + lax.broadcasted_iota(jnp.int32, (block_rows, _LANES), 0)
        sq = jnp.where(row_ids < valid_rows, d * d, 0.0)
        out_ref[...] += jnp.sum(sq, axis=0, keepdims=True)


def _round_up(x, m):
    return (x + m - 1) // m * m


def _default_num_cores():
    """2 for chips that expose two TensorCores to one Pallas grid (v7x,
    v4/v5p megacore); 1 for single-TC chips (v5e, v6e) and per-core devices
    (v2/v3).  Any value is correct (clamp + mask handles duplicates); this
    only avoids a wasted duplicate-block DMA on single-TC chips."""
    try:
        kind = jax.devices()[0].device_kind.lower()
    except Exception:
        return 1
    single_tc = ("v5e", "v5 lite", "v5lite", "v6e", "v6 lite", "v6lite", "v2", "v3")
    if any(s in kind for s in single_tc):
        return 1
    return 2


def rmse_loss(output, targets, *, max_tile_bytes=4 << 20, num_cores=None):
    assert output.shape == targets.shape, "output/targets must have same shape"
    n = int(output.size)
    if n == 0:
        # torch's MSELoss on empty input yields NaN; match that.
        return jnp.float32(jnp.nan)

    o = output.reshape(-1)
    t = targets.reshape(-1)

    rem = n % _LANES
    if rem:
        # TODO(synk): rare path — only the (n % 128) tail needs padding, but
        # jnp.pad copies the whole flat array; common shapes (numel % 128 == 0)
        # take the zero-copy branch.  Equal zero padding contributes 0.
        pad = _LANES - rem
        o = jnp.pad(o, (0, pad))
        t = jnp.pad(t, (0, pad))

    rows = o.size // _LANES
    o2 = o.reshape(rows, _LANES)
    t2 = t.reshape(rows, _LANES)

    o_item = int(o2.dtype.itemsize)
    t_item = int(t2.dtype.itemsize)

    # Sublane multiple for the (second-minor) block dim: 8 for 4-byte dtypes,
    # 16 for 2-byte, 32 for 1-byte (driven by the narrower input's packing).
    sub_mult = 8 * max(1, 4 // min(o_item, t_item, 4))

    # Tile sizing: keep bytes-per-tile (per input, per pipeline buffer) roughly
    # constant across dtypes so per-step DMA time amortizes the fixed
    # per-grid-step overhead on all generations.
    rows_cap = max(
        sub_mult,
        (max_tile_bytes // (_LANES * max(o_item, t_item))) // sub_mult * sub_mult,
    )
    block_rows = min(rows_cap, _round_up(rows, sub_mult))

    total_blocks = pl.cdiv(rows, block_rows)
    if num_cores is None:
        num_cores = _default_num_cores()
    num_cores = max(1, min(int(num_cores), total_blocks))
    steps = pl.cdiv(total_blocks, num_cores)
    last_blk = total_blocks - 1

    def in_map(c, i):
        # Clamp so the DMA never targets a block index past the array; the
        # kernel masks the duplicate work to zero.
        return (jnp.minimum(c * steps + i, last_blk), 0)

    # Scoped VMEM: 2 inputs x 2 pipeline buffers + f32 elementwise
    # intermediates + slack.  Raised explicitly (v5e default is only 16 MiB),
    # capped with headroom under v7x's 64 MiB physical VMEM.
    tile_in_bytes = block_rows * _LANES * (o_item + t_item)
    tile_f32_bytes = block_rows * _LANES * 4
    vmem_limit = int(
        min(48 << 20, max(16 << 20, 2 * tile_in_bytes + 3 * tile_f32_bytes + (2 << 20)))
    )

    cost = pl.CostEstimate(
        flops=3 * n,            # sub, mul, add per element
        transcendentals=0,
        bytes_accessed=n * (o_item + t_item) + num_cores * _LANES * 4,
    )

    kernel = functools.partial(
        _rmse_partial_kernel,
        block_rows=block_rows,
        valid_rows=rows,
        steps=steps,
    )

    partials = pl.pallas_call(
        kernel,
        out_shape=jax.ShapeDtypeStruct((num_cores, _LANES), jnp.float32),
        grid_spec=pltpu.PrefetchScalarGridSpec(
            num_scalar_prefetch=0,
            grid=(num_cores, steps),
            in_specs=[
                pl.BlockSpec((block_rows, _LANES), in_map),
                pl.BlockSpec((block_rows, _LANES), in_map),
            ],
            out_specs=pl.BlockSpec((1, _LANES), lambda c, i: (c, 0)),
        ),
        compiler_params=pltpu.CompilerParams(
            dimension_semantics=("parallel", "arbitrary"),
            vmem_limit_bytes=vmem_limit,
        ),
        cost_estimate=cost,
    )(o2, t2)

    # Single tiny cross-lane reduction + sqrt(mean) outside the kernel.
    return jnp.sqrt(jnp.sum(partials) / jnp.float32(n))


if __name__ == "__main__":
    key = jax.random.PRNGKey(0)
    k1, k2, k3, k4, k5, k6 = jax.random.split(key, 6)

    def ref_rmse(a, b):
        return jnp.sqrt(jnp.mean((a.astype(jnp.float32) - b.astype(jnp.float32)) ** 2))

    # 1) NCHW-style regression inputs (numel % 128 == 0: zero-copy reshape path).
    x_shape = (2, 4, 16, 16)
    o1 = jax.random.normal(k1, x_shape, dtype=jnp.float32)
    t1 = jax.random.normal(k2, x_shape, dtype=jnp.float32)
    r1 = rmse_loss(o1, t1)
    jax.block_until_ready(r1)
    assert jnp.allclose(r1, ref_rmse(o1, t1), rtol=1e-6, atol=1e-6), (r1, ref_rmse(o1, t1))

    # 2) Ragged numel (not a multiple of 128): exercises the in-kernel row mask.
    y_shape = (3, 5, 7, 11)
    o2_ = jax.random.normal(k3, y_shape, dtype=jnp.float32)
    t2_ = jax.random.normal(k4, y_shape, dtype=jnp.float32)
    r2 = rmse_loss(o2_, t2_)
    jax.block_until_ready(r2)
    assert jnp.allclose(r2, ref_rmse(o2_, t2_), rtol=1e-6, atol=1e-6), (r2, ref_rmse(o2_, t2_))

    # 3) Multi-step / 2-core grid with a small forced tile: exercises the
    #    unmasked steady-state path, accumulation across steps, and the
    #    clamped duplicate-block masking (3 real blocks over a (2, 2) grid).
    z_shape = (192, 128)
    o3 = jax.random.normal(k5, z_shape, dtype=jnp.float32)
    t3 = jax.random.normal(k6, z_shape, dtype=jnp.float32)
    r3 = rmse_loss(o3, t3, max_tile_bytes=64 * _LANES * 4, num_cores=2)
    jax.block_until_ready(r3)
    assert jnp.allclose(r3, ref_rmse(o3, t3), rtol=1e-4, atol=1e-6), (r3, ref_rmse(o3, t3))

    print("KERNEL_OK")
</pallas_src>

<mosaic_0001>
module attributes {stable_mosaic.version = 11 : i64} {
  func.func @_rmse_partial_kernel(%arg0: i32, %arg1: i32, %arg2: memref<16x128xf32, #tpu.memory_space<vmem>>, %arg3: memref<16x128xf32, #tpu.memory_space<vmem>>, %arg4: memref<1x128xf32, #tpu.memory_space<vmem>>) attributes {dimension_semantics = [#tpu.dimension_semantics<parallel>, #tpu.dimension_semantics<arbitrary>], iteration_bounds = array<i64: 1, 1>, scalar_prefetch = 0 : i64, scratch_operands = 0 : i64, tpu.core_type = #tpu.core_type<tc>, window_params = [{transform_indices = @transform_0, window_bounds = array<i64: 16, 128>}, {transform_indices = @transform_1, window_bounds = array<i64: 16, 128>}, {transform_indices = @transform_2, window_bounds = array<i64: 1, 128>}]} {
    %c0_i32 = arith.constant 0 : i32
    %0 = arith.cmpi eq, %arg1, %c0_i32 : i32
    %1 = arith.extui %0 : i1 to i32
    %c0_i32_0 = arith.constant 0 : i32
    %2 = arith.cmpi ne, %1, %c0_i32_0 : i32
    scf.if %2 {
      %cst = arith.constant 0.000000e+00 : f32
      %13 = vector.broadcast %cst : f32 to vector<1x128xf32>
      %c0 = arith.constant 0 : index
      %c0_5 = arith.constant 0 : index
      %14 = vector.load %arg4[%c0, %c0_5] : memref<1x128xf32, #tpu.memory_space<vmem>>, vector<1x128xf32>
      tpu.vector_store %arg4[%c0, %c0_5], %13 {strides = array<i32>} : memref<1x128xf32, #tpu.memory_space<vmem>>, vector<1x128xf32>,
    } else {
    }
    %c1_i32 = arith.constant 1 : i32
    %3 = arith.muli %arg0, %c1_i32 : i32
    %4 = arith.addi %3, %arg1 : i32
    %c16_i32 = arith.constant 16 : i32
    %5 = arith.muli %4, %c16_i32 : i32
    %c16_i32_1 = arith.constant 16 : i32
    %6 = arith.addi %5, %c16_i32_1 : i32
    %c16_i32_2 = arith.constant 16 : i32
    %7 = arith.cmpi sgt, %6, %c16_i32_2 : i32
    %true = arith.constant true
    %8 = arith.xori %7, %true : i1
    %9 = arith.extui %8 : i1 to i32
    %c0_i32_3 = arith.constant 0 : i32
    %10 = arith.cmpi ne, %9, %c0_i32_3 : i32
    scf.if %10 {
      %c0 = arith.constant 0 : index
      %c0_5 = arith.constant 0 : index
      %13 = vector.load %arg2[%c0, %c0_5] : memref<16x128xf32, #tpu.memory_space<vmem>>, vector<16x128xf32>
      %c0_6 = arith.constant 0 : index
      %c0_7 = arith.constant 0 : index
      %14 = vector.load %arg3[%c0_6, %c0_7] : memref<16x128xf32, #tpu.memory_space<vmem>>, vector<16x128xf32>
      %15 = arith.subf %13, %14 : vector<16x128xf32>
      %c0_8 = arith.constant 0 : index
      %c0_9 = arith.constant 0 : index
      %16 = vector.load %arg4[%c0_8, %c0_9] : memref<1x128xf32, #tpu.memory_space<vmem>>, vector<1x128xf32>
      %17 = arith.mulf %15, %15 : vector<16x128xf32>
      %cst = arith.constant dense<0.000000e+00> : vector<128xf32>
      %18 = vector.multi_reduction <add>, %17, %cst [0] : vector<16x128xf32> to vector<128xf32>
      %19 = vector.shape_cast %18 : vector<128xf32> to vector<1x128xf32>
      %20 = arith.addf %16, %19 : vector<1x128xf32>
      %c0_10 = arith.constant 0 : index
      %c0_11 = arith.constant 0 : index
      %21 = vector.load %arg4[%c0_10, %c0_11] : memref<1x128xf32, #tpu.memory_space<vmem>>, vector<1x128xf32>
      tpu.vector_store %arg4[%c0_10, %c0_11], %20 {strides = array<i32>} : memref<1x128xf32, #tpu.memory_space<vmem>>, vector<1x128xf32>,
    } else {
    }
    %11 = arith.extui %7 : i1 to i32
    %c0_i32_4 = arith.constant 0 : i32
    %12 = arith.cmpi ne, %11, %c0_i32_4 : i32
    scf.if %12 {
      %c0 = arith.constant 0 : index
      %c0_5 = arith.constant 0 : index
      %13 = vector.load %arg2[%c0, %c0_5] : memref<16x128xf32, #tpu.memory_space<vmem>>, vector<16x128xf32>
      %c0_6 = arith.constant 0 : index
      %c0_7 = arith.constant 0 : index
      %14 = vector.load %arg3[%c0_6, %c0_7] : memref<16x128xf32, #tpu.memory_space<vmem>>, vector<16x128xf32>
      %15 = arith.subf %13, %14 : vector<16x128xf32>
      %16 = tpu.iota {dimensions = array<i32: 0>} : vector<16x128xi32>
      %17 = vector.broadcast %5 : i32 to vector<16x128xi32>
      %18 = arith.addi %17, %16 : vector<16x128xi32>
      %c16_i32_8 = arith.constant 16 : i32
      %19 = vector.broadcast %c16_i32_8 : i32 to vector<16x128xi32>
      %20 = arith.cmpi slt, %18, %19 : vector<16x128xi32>
      %21 = arith.mulf %15, %15 : vector<16x128xf32>
      %cst = arith.constant 0.000000e+00 : f32
      %22 = vector.broadcast %cst : f32 to vector<16x128xf32>
      %23 = arith.select %20, %21, %22 : vector<16x128xi1>, vector<16x128xf32>
      %c0_9 = arith.constant 0 : index
      %c0_10 = arith.constant 0 : index
      %24 = vector.load %arg4[%c0_9, %c0_10] : memref<1x128xf32, #tpu.memory_space<vmem>>, vector<1x128xf32>
      %cst_11 = arith.constant dense<0.000000e+00> : vector<128xf32>
      %25 = vector.multi_reduction <add>, %23, %cst_11 [0] : vector<16x128xf32> to vector<128xf32>
      %26 = vector.shape_cast %25 : vector<128xf32> to vector<1x128xf32>
      %27 = arith.addf %24, %26 : vector<1x128xf32>
      %c0_12 = arith.constant 0 : index
      %c0_13 = arith.constant 0 : index
      %28 = vector.load %arg4[%c0_12, %c0_13] : memref<1x128xf32, #tpu.memory_space<vmem>>, vector<1x128xf32>
      tpu.vector_store %arg4[%c0_12, %c0_13], %27 {strides = array<i32>} : memref<1x128xf32, #tpu.memory_space<vmem>>, vector<1x128xf32>,
    } else {
    }
    return
  }
  func.func @transform_0(%arg0: i32, %arg1: i32) -> (i32, i32) {
    %c1_i32 = arith.constant 1 : i32
    %0 = arith.muli %arg0, %c1_i32 : i32
    %1 = arith.addi %0, %arg1 : i32
    %c0_i32 = arith.constant 0 : i32
    %2 = arith.minsi %1, %c0_i32 : i32
    %c0_i32_0 = arith.constant 0 : i32
    %c0_i32_1 = arith.constant 0 : i32
    return %2, %c0_i32_0 : i32, i32
  }
  func.func @transform_1(%arg0: i32, %arg1: i32) -> (i32, i32) {
    %c1_i32 = arith.constant 1 : i32
    %0 = arith.muli %arg0, %c1_i32 : i32
    %1 = arith.addi %0, %arg1 : i32
    %c0_i32 = arith.constant 0 : i32
    %2 = arith.minsi %1, %c0_i32 : i32
    %c0_i32_0 = arith.constant 0 : i32
    %c0_i32_1 = arith.constant 0 : i32
    return %2, %c0_i32_0 : i32, i32
  }
  func.func @transform_2(%arg0: i32, %arg1: i32) -> (i32, i32) {
    %c0_i32 = arith.constant 0 : i32
    %c0_i32_0 = arith.constant 0 : i32
    return %arg0, %c0_i32 : i32, i32
  }
}

</mosaic_0001>

<bundles_post_ra>
// kernel: tpu_custom_call.1
= control target key start
LH: loop header
LB: loop body
LE: loop exit
PB: predicated region body
PF: predicated region fallthrough
CT: control target
= control target key end

     0   :  { %7 = vsyncpa [#allocation3], 0  ;;  %s262_s0 = inlined_call_operand.hbm [shape: f32[16,128], index: 0, kind: input, shape index: {}]   ;;  %s263_s1 = inlined_call_operand.hbm [shape: f32[16,128], index: 1, kind: input, shape index: {}]   ;;  %s264_s2 = inlined_call_operand.hbm [shape: f32[1,128], index: 2, kind: output, shape index: {}]  }
   0x1   :  { %8 = vsyncpa [#allocation6], 0 }
   0x2   :  { %9 = vsyncpa [#allocation4], 0  ;;  %s20_s11 = sshll.u32 %s262_s0, 4  ;;  %s232_s12 = smov [#allocation2]   ;;  %s21_s11 = int_to_ptr.hbm [resolvable:$true] %s20_s11 }
   0x3   :  { %s22_s13 = sshll.u32 %s232_s12, 4  ;;  %s39_s16 = sshll.u32 %s263_s1, 4  ;;  %s23_s13 = int_to_ptr.vmem [resolvable:$true] %s22_s13  ;;  %s40_s16 = int_to_ptr.hbm [resolvable:$true] %s39_s16 }
   0x4   :  { %s233_s17 = smov 128   ;;  %s234_s18 = smov 8  }
   0x5   :  { %28 = dma.hbm_to_vmem [thread:$0]  %s21_s11, 256, %s23_s13, [#allocation3], %s233_s17, %s233_s17, %s234_s18  }
   0x6   :  { %s235_s19 = smov [#allocation5]  }
   0x7   :  { %s41_s20 = sshll.u32 %s235_s19, 4  ;;  %s42_s20 = int_to_ptr.vmem [resolvable:$true] %s41_s20 }
   0x8   :  { %47 = dma.hbm_to_vmem [thread:$0]  %s40_s16, 256, %s42_s20, [#allocation6], %s233_s17, %s233_s17, %s234_s18  }
   0x9   :  { %226 = dma.done.wait [#allocation3], 256  }
   0xa   :  { %227 = vsyncadd [#allocation3], 4294967040 }
   0xb   :  { %228 = dma.done.wait [#allocation6], 256  }
   0xc   :  { %229 = vsyncadd [#allocation6], 4294967040  ;;  %v236_v0 = vmov 0.0   ;;  %v77_v1 = vld [vmem:[#allocation2] sm:$0xff]  ;;  %v78_v2 = vld [vmem:[#allocation2 + $0x8] sm:$0xff]  ;;  %s237_s0 = smov [#allocation7]  }
   0xd   :  { %68 = vst [vmem:[#allocation7] sm:$0x1] %v236_v0  ;;  %v79_v3 = vld [vmem:[#allocation5] sm:$0xff]  ;;  %v80_v4 = vld [vmem:[#allocation5 + $0x8] sm:$0xff]  ;;  %s131_s1 = sshll.u32 %s237_s0, 4  ;;  %s133_s23 = sshll.u32 %s264_s2, 4  ;;  %s132_s1 = int_to_ptr.vmem [resolvable:$true] %s131_s1  ;;  %s134_s23 = int_to_ptr.hbm [resolvable:$true] %s133_s23 }
   0xe   :  { %v81_v5 = vsub.f32 %v77_v1, %v79_v3  ;;  %v82_v6 = vsub.f32 %v78_v2, %v80_v4 }
  0x10   :  { %v84_v7 = vmul.f32 %v81_v5, %v81_v5  ;;  %v85_v8 = vmul.f32 %v82_v6, %v82_v6 }
  0x12   :  { %v86_v9 = vadd.f32 %v85_v8, %v84_v7 }
  0x14   :  { %v87_v10 = vrot.slane %v86_v9, 4  ;;  %v83_v15 = vld [vmem:[#allocation7] sm:$0x1] }
  0x16   :  { %v88_v11 = vadd.f32 %v87_v10, %v86_v9 }
  0x18   :  { %v89_v12 = vrot.slane %v88_v11, 2 }
  0x1a   :  { %v90_v13 = vadd.f32 %v89_v12, %v88_v11 }
  0x1c   :  { %v91_v14 = vrot.slane %v90_v13, 1 }
  0x1e   :  { %v92_v16 = vadd.f32 %v91_v14, %v90_v13 }
  0x20   :  { %v93_v17 = vadd.f32 %v92_v16, %v83_v15 }
  0x22   :  { %94 = vst [vmem:[#allocation7] sm:$0x1] %v93_v17 }
  0x23   :  { %136 = dma.vmem_to_hbm [thread:$0]  %s132_s1, 16, %s134_s23, [#allocation4]  }
  0x24   :  { %230 = dma.done.wait [#allocation4], 16  }
  0x25   :  { %231 = vsyncadd [#allocation4], 4294967280 }
  0x26   :  { %141 = vsyncpa [#allocation3], 1 }
  0x27   :  { %142 = vsyncpa [#allocation6], 1 }
  0x28   :  { %143 = vsyncpa [#allocation4], 1 }

</bundles_post_ra>
